<compile_context>
chip_gen: v7x
topology: tpu7x:2x2x1
jax: 0.10.0
libtpu: 0.0.40
codegen_flags: <defaults>
</compile_context>

<pallas_src>
import numpy as np
import jax
import jax.numpy as jnp
from jax.experimental import pallas as pl
from jax.experimental.pallas import tpu as pltpu


_MAX_BLOCK_ELEMS = 512 * 1024          # ~2 MiB of f32 per pipelined block
_TARGET_GRID_STEPS = 8                 # keep several steps for megacore / pipeline
_VMEM_LIMIT_BYTES = 48 * 1024 * 1024   # fits v7x (64 MiB physical) and v5e/v6e


def _cdiv(a, b):
    return -(-a // b)


def _round_up(a, b):
    return ((a + b - 1) // b) * b


# ----------------------------------------------------------------------------
# Kernel A: depthwise 1-D correlation along the LANE (last) axis.
#   w_ref : SMEM (K,)          filter taps
#   x_ref : VMEM (TR, W)       unpadded rows (full W per block)
#   o_ref : VMEM (TR, W)       output rows
#   xp_ref: VMEM (TR, W+2*pad) scratch: reflect-padded rows built in-kernel
# ----------------------------------------------------------------------------
def _make_lane_conv_kernel(K, W, pad):
    def kernel(w_ref, x_ref, o_ref, xp_ref):
        x = x_ref[...].astype(jnp.float32)
        xp_ref[:, pad:pad + W] = x
        for j in range(pad):  # reflect border (no edge repeat), pad is tiny/static
            xp_ref[:, j:j + 1] = x[:, pad - j:pad - j + 1]
            xp_ref[:, pad + W + j:pad + W + j + 1] = x[:, W - 2 - j:W - 1 - j]
        acc = xp_ref[:, 0:W] * w_ref[0]
        for k in range(1, K):  # K is small & static -> fully unrolled
            acc = acc + xp_ref[:, k:k + W] * w_ref[k]
        o_ref[...] = acc.astype(o_ref.dtype)
    return kernel


# ----------------------------------------------------------------------------
# Kernel B: depthwise 1-D correlation along the SUBLANE (middle) axis.
#   w_ref : SMEM (K,)
#   x_ref : VMEM (1, L, TQ)       full conv axis L per block, lanes = trailing dims
#   o_ref : VMEM (1, L, TQ)
#   xp_ref: VMEM (1, L+2*pad, TQ) scratch: reflect-padded slab built in-kernel
# ----------------------------------------------------------------------------
def _make_sublane_conv_kernel(K, L, pad):
    def kernel(w_ref, x_ref, o_ref, xp_ref):
        x = x_ref[...].astype(jnp.float32)                       # (1, L, TQ)
        xp_ref[:, pad:pad + L, :] = x
        for j in range(pad):
            xp_ref[:, j:j + 1, :] = x[:, pad - j:pad - j + 1, :]
            xp_ref[:, pad + L + j:pad + L + j + 1, :] = x[:, L - 2 - j:L - 1 - j, :]
        acc = xp_ref[:, 0:L, :] * w_ref[0]
        for k in range(1, K):
            acc = acc + xp_ref[:, k:k + L, :] * w_ref[k]
        o_ref[...] = acc.astype(o_ref.dtype)
    return kernel


# ----------------------------------------------------------------------------
# Tile-size selection (fits VMEM on all generations, keeps several grid steps).
# ----------------------------------------------------------------------------
def _choose_row_tile(R, W):
    if R < 8:
        return R                                  # full-dim block is always legal
    cap = max(8, (_MAX_BLOCK_ELEMS // max(W, 1)) // 8 * 8)
    cap = min(cap, 1024)
    want = _round_up(max(8, _cdiv(R, _TARGET_GRID_STEPS)), 8)
    tr = min(cap, want, _round_up(R, 8))
    return max(8, (tr // 8) * 8)


def _choose_lane_tile(Q, L):
    if Q < 128:
        return Q                                  # full-dim block is always legal
    cap = max(128, (_MAX_BLOCK_ELEMS // max(L, 1)) // 128 * 128)
    cap = min(cap, 4096)
    want = _round_up(max(128, _cdiv(Q, _TARGET_GRID_STEPS)), 128)
    full = (Q // 128) * 128
    return max(128, min(cap, want, full))


# ----------------------------------------------------------------------------
# pallas_call wrappers
# ----------------------------------------------------------------------------
def _conv_lane(x2d, weights, K, pad):
    R, W = x2d.shape
    TR = _choose_row_tile(R, W)
    return pl.pallas_call(
        _make_lane_conv_kernel(K, W, pad),
        out_shape=jax.ShapeDtypeStruct((R, W), x2d.dtype),
        grid=(_cdiv(R, TR),),
        in_specs=[
            pl.BlockSpec(memory_space=pltpu.MemorySpace.SMEM),   # filter taps
            pl.BlockSpec((TR, W), lambda i: (i, 0)),
        ],
        out_specs=pl.BlockSpec((TR, W), lambda i: (i, 0)),
        scratch_shapes=[pltpu.VMEM((TR, W + 2 * pad), jnp.float32)],
        compiler_params=pltpu.CompilerParams(
            dimension_semantics=("parallel",),
            vmem_limit_bytes=_VMEM_LIMIT_BYTES),
    )(weights, x2d)


def _conv_sublane(x3d, weights, K, pad):
    P, L, Q = x3d.shape
    TQ = _choose_lane_tile(Q, L)
    return pl.pallas_call(
        _make_sublane_conv_kernel(K, L, pad),
        out_shape=jax.ShapeDtypeStruct((P, L, Q), x3d.dtype),
        grid=(P, _cdiv(Q, TQ)),
        in_specs=[
            pl.BlockSpec(memory_space=pltpu.MemorySpace.SMEM),   # filter taps
            pl.BlockSpec((1, L, TQ), lambda p, q: (p, 0, q)),
        ],
        out_specs=pl.BlockSpec((1, L, TQ), lambda p, q: (p, 0, q)),
        scratch_shapes=[pltpu.VMEM((1, L + 2 * pad, TQ), jnp.float32)],
        compiler_params=pltpu.CompilerParams(
            dimension_semantics=("parallel", "parallel"),
            vmem_limit_bytes=_VMEM_LIMIT_BYTES),
    )(weights, x3d)


# ----------------------------------------------------------------------------
# Glue reproducing convn_layer_Filter2D_torch.forward semantics.
# ----------------------------------------------------------------------------
def _get_4d(x):
    while x.ndim < 4:
        x = x[None]
    return x


def convn_layer_filter2d(input_tensor, kernel, dim):
    """1-D filtering of an n-D tensor (n<=4) along `dim`, reflect border,
    cross-correlation (no kernel flip), output has the same shape as input."""
    original_ndim = input_tensor.ndim
    if original_ndim > 4:
        raise ValueError("expected tensor of rank <= 4")
    x4 = _get_4d(input_tensor)

    # dim remapping exactly as in the torch module
    d = dim
    if d >= 0:
        d = d - original_ndim
    dim4 = 4 - abs(d)  # axis of the 4-D tensor to filter along

    K = int(kernel.shape[0])
    pad = K // 2  # filter2D_torch pads the conv axis by (K//2, K//2)
    shape4 = x4.shape
    L = int(shape4[dim4])
    if L <= pad:
        raise ValueError(
            f"reflect padding requires conv-axis length > kernel_size//2 "
            f"(axis length {L}, kernel {K})")

    w = jnp.asarray(kernel, jnp.float32).reshape(K)
    x4f = x4.astype(jnp.float32)

    if dim4 == 3:
        # Conv axis is already the lane axis: flatten leading dims into rows.
        R = int(np.prod(shape4[:3]))
        out4 = _conv_lane(x4f.reshape(R, shape4[3]), w, K, pad).reshape(shape4)
    else:
        # Conv along the sublane axis: reshape (no transpose) to (pre, L, post).
        P = int(np.prod(shape4[:dim4])) if dim4 > 0 else 1
        Q = int(np.prod(shape4[dim4 + 1:]))
        out4 = _conv_sublane(x4f.reshape(P, L, Q), w, K, pad).reshape(shape4)

    out4 = out4.astype(input_tensor.dtype)
    if original_ndim == 2:
        return out4[0, 0]
    if original_ndim == 3:
        return out4[0]
    return out4


# ----------------------------------------------------------------------------
# Pure-JAX reference (same math, no Pallas) for a sanity check.
# ----------------------------------------------------------------------------
def _reference(input_tensor, kernel, dim):
    original_ndim = input_tensor.ndim
    x4 = _get_4d(input_tensor).astype(jnp.float32)
    d = dim
    if d >= 0:
        d = d - original_ndim
    dim4 = 4 - abs(d)
    K = int(kernel.shape[0])
    pad = K // 2
    xm = jnp.moveaxis(x4, dim4, -1)
    W = xm.shape[-1]
    xp = jnp.pad(xm, [(0, 0)] * 3 + [(pad, pad)], mode="reflect")
    out = sum(xp[..., k:k + W] * kernel[k].astype(jnp.float32) for k in range(K))
    out = jnp.moveaxis(out, -1, dim4).astype(input_tensor.dtype)
    if original_ndim == 2:
        return out[0, 0]
    if original_ndim == 3:
        return out[0]
    return out


if __name__ == "__main__":
    key = jax.random.PRNGKey(0)
    kx, k3, k4 = jax.random.split(key, 3)

    # Small NCHW input and deterministic 1-D kernels.
    x = jax.random.normal(kx, (2, 4, 16, 16), dtype=jnp.float32)
    kern3 = jax.random.normal(k3, (3,), dtype=jnp.float32)
    kern4 = jax.random.normal(k4, (4,), dtype=jnp.float32)   # even-length kernel

    cases = [
        (x, kern3, 0),        # conv along batch   (sublane-axis kernel)
        (x, kern3, 1),        # conv along channel (sublane-axis kernel)
        (x, kern3, 2),        # conv along height  (sublane-axis kernel)
        (x, kern3, 3),        # conv along width   (lane-axis kernel)
        (x, kern4, 3),        # even-length kernel
        (x[0], kern3, 1),     # 3-D input
        (x[0, 0], kern3, -1)  # 2-D input, negative dim
    ]

    ok = True
    for xin, kern, dim in cases:
        out = jax.block_until_ready(convn_layer_filter2d(xin, kern, dim))
        ref = jax.block_until_ready(_reference(xin, kern, dim))
        if out.shape != xin.shape:
            ok = False
        if not np.allclose(np.asarray(out), np.asarray(ref), atol=1e-5, rtol=1e-5):
            ok = False

    if ok:
        print("KERNEL_OK")
</pallas_src>

<mosaic_0001>
module attributes {stable_mosaic.version = 11 : i64} {
  func.func @kernel(%arg0: i32, %arg1: i32, %arg2: memref<3xf32, #tpu.memory_space<smem>>, %arg3: memref<1x2x128xf32, #tpu.memory_space<vmem>>, %arg4: memref<1x2x128xf32, #tpu.memory_space<vmem>>, %arg5: memref<1x4x128xf32, #tpu.memory_space<vmem>>) attributes {dimension_semantics = [#tpu.dimension_semantics<parallel>, #tpu.dimension_semantics<parallel>], iteration_bounds = array<i64: 1, 8>, scalar_prefetch = 0 : i64, scratch_operands = 1 : i64, tpu.core_type = #tpu.core_type<tc>, window_params = [{transform_indices = @transform_0, window_bounds = array<i64: 3>}, {transform_indices = @transform_1, window_bounds = array<i64: 1, 2, 128>}, {transform_indices = @transform_2, window_bounds = array<i64: 1, 2, 128>}]} {
    %c0 = arith.constant 0 : index
    %c0_0 = arith.constant 0 : index
    %c0_1 = arith.constant 0 : index
    %0 = vector.load %arg3[%c0, %c0_0, %c0_1] : memref<1x2x128xf32, #tpu.memory_space<vmem>>, vector<1x2x128xf32>
    %c0_2 = arith.constant 0 : index
    %c1 = arith.constant 1 : index
    %c0_3 = arith.constant 0 : index
    %1 = vector.load %arg5[%c0_2, %c1, %c0_3] : memref<1x4x128xf32, #tpu.memory_space<vmem>>, vector<1x2x128xf32>
    tpu.vector_store %arg5[%c0_2, %c1, %c0_3], %0 {strides = array<i32>} : memref<1x4x128xf32, #tpu.memory_space<vmem>>, vector<1x2x128xf32>,
    %2 = vector.extract_strided_slice %0 {offsets = [0, 1, 0], sizes = [1, 1, 128], strides = [1, 1, 1]} : vector<1x2x128xf32> to vector<1x1x128xf32>
    %c0_4 = arith.constant 0 : index
    %c0_5 = arith.constant 0 : index
    %c0_6 = arith.constant 0 : index
    %3 = vector.load %arg5[%c0_4, %c0_5, %c0_6] : memref<1x4x128xf32, #tpu.memory_space<vmem>>, vector<1x1x128xf32>
    tpu.vector_store %arg5[%c0_4, %c0_5, %c0_6], %2 {strides = array<i32>} : memref<1x4x128xf32, #tpu.memory_space<vmem>>, vector<1x1x128xf32>,
    %4 = vector.extract_strided_slice %0 {offsets = [0, 0, 0], sizes = [1, 1, 128], strides = [1, 1, 1]} : vector<1x2x128xf32> to vector<1x1x128xf32>
    %c0_7 = arith.constant 0 : index
    %c3 = arith.constant 3 : index
    %c0_8 = arith.constant 0 : index
    %5 = vector.load %arg5[%c0_7, %c3, %c0_8] : memref<1x4x128xf32, #tpu.memory_space<vmem>>, vector<1x1x128xf32>
    tpu.vector_store %arg5[%c0_7, %c3, %c0_8], %4 {strides = array<i32>} : memref<1x4x128xf32, #tpu.memory_space<vmem>>, vector<1x1x128xf32>,
    %c0_9 = arith.constant 0 : index
    %c0_10 = arith.constant 0 : index
    %c0_11 = arith.constant 0 : index
    %6 = vector.load %arg5[%c0_9, %c0_10, %c0_11] : memref<1x4x128xf32, #tpu.memory_space<vmem>>, vector<1x2x128xf32>
    %c0_12 = arith.constant 0 : index
    %7 = memref.load %arg2[%c0_12] : memref<3xf32, #tpu.memory_space<smem>>
    %8 = vector.broadcast %7 : f32 to vector<1x2x128xf32>
    %9 = arith.mulf %6, %8 : vector<1x2x128xf32>
    %c0_13 = arith.constant 0 : index
    %c1_14 = arith.constant 1 : index
    %c0_15 = arith.constant 0 : index
    %10 = vector.load %arg5[%c0_13, %c1_14, %c0_15] : memref<1x4x128xf32, #tpu.memory_space<vmem>>, vector<1x2x128xf32>
    %c1_16 = arith.constant 1 : index
    %11 = memref.load %arg2[%c1_16] : memref<3xf32, #tpu.memory_space<smem>>
    %12 = vector.broadcast %11 : f32 to vector<1x2x128xf32>
    %13 = arith.mulf %10, %12 : vector<1x2x128xf32>
    %14 = arith.addf %9, %13 : vector<1x2x128xf32>
    %c0_17 = arith.constant 0 : index
    %c2 = arith.constant 2 : index
    %c0_18 = arith.constant 0 : index
    %15 = vector.load %arg5[%c0_17, %c2, %c0_18] : memref<1x4x128xf32, #tpu.memory_space<vmem>>, vector<1x2x128xf32>
    %c2_19 = arith.constant 2 : index
    %16 = memref.load %arg2[%c2_19] : memref<3xf32, #tpu.memory_space<smem>>
    %17 = vector.broadcast %16 : f32 to vector<1x2x128xf32>
    %18 = arith.mulf %15, %17 : vector<1x2x128xf32>
    %19 = arith.addf %14, %18 : vector<1x2x128xf32>
    %c0_20 = arith.constant 0 : index
    %c0_21 = arith.constant 0 : index
    %c0_22 = arith.constant 0 : index
    %20 = vector.load %arg4[%c0_20, %c0_21, %c0_22] : memref<1x2x128xf32, #tpu.memory_space<vmem>>, vector<1x2x128xf32>
    tpu.vector_store %arg4[%c0_20, %c0_21, %c0_22], %19 {strides = array<i32>} : memref<1x2x128xf32, #tpu.memory_space<vmem>>, vector<1x2x128xf32>,
    return
  }
  func.func @transform_0(%arg0: i32, %arg1: i32) -> i32 {
    %c0_i32 = arith.constant 0 : i32
    %c0_i32_0 = arith.constant 0 : i32
    return %c0_i32 : i32
  }
  func.func @transform_1(%arg0: i32, %arg1: i32) -> (i32, i32, i32) {
    %c0_i32 = arith.constant 0 : i32
    %c0_i32_0 = arith.constant 0 : i32
    return %arg0, %c0_i32, %arg1 : i32, i32, i32
  }
  func.func @transform_2(%arg0: i32, %arg1: i32) -> (i32, i32, i32) {
    %c0_i32 = arith.constant 0 : i32
    %c0_i32_0 = arith.constant 0 : i32
    return %arg0, %c0_i32, %arg1 : i32, i32, i32
  }
}

</mosaic_0001>

<bundles_post_ra>
// kernel: tpu_custom_call.1
= control target key start
LH: loop header
LB: loop body
LE: loop exit
PB: predicated region body
PF: predicated region fallthrough
CT: control target
= control target key end

     0   :  { %7 = vsyncpa [#allocation6], 0  ;;  %s781_s0 = inlined_call_operand.hbm [shape: f32[3], index: 0, kind: input, shape index: {}]   ;;  %s782_s1 = inlined_call_operand.hbm [shape: f32[1,2,1024], index: 1, kind: input, shape index: {}]   ;;  %s783_s2 = inlined_call_operand.hbm [shape: f32[1,2,1024], index: 2, kind: output, shape index: {}]  }
   0x1   :  { %8 = vsyncpa [#allocation4], 0 }
   0x2   :  { %10 = vsyncpa [#allocation4 + $0x1], 0 }
   0x3   :  { %11 = vsyncpa [#allocation5], 0 }
   0x4   :  { %13 = vsyncpa [#allocation5 + $0x1], 0  ;;  %s557_s9 = smov 0   ;;  %s559_s10 = smov 0  }
   0x5   :  { %s561_s11 = smov 0   ;;  %s563_s12 = smov 0  }
   0x6   :  { %s565_s13 = smov 0   ;;  %s567_s14 = smov 0  }
   0x7 LB: > { %s318_s15 = sadd.s32 4294967295, %s537_s14   ;;  %s319_s16 = sadd.s32 4294967294, %s537_s14   ;;  %s537_s14 = sphi %s567_s14, %s19_s14   ;;  %s533_s13 = sphi %s565_s13, %s806_s13   ;;  %s529_s12 = sphi %s563_s12, %s805_s12   ;;  %s525_s11 = sphi %s561_s11, %s804_s11   ;;  %s521_s10 = sphi %s559_s10, %s803_s10   ;;  %s517_s9 = sphi %s557_s9, %s802_s9  }
   0x8   : > { %p74_p0 = scmp.ne.s32.totalorder %s521_s10, %s517_s9  ;;  %p591_p1 = scmp.eq.s32.totalorder %s318_s15, 0 }
   0x9   : > { %p595_p2 = scmp.eq.s32.totalorder %s318_s15, 7  ;;  %p106_p3 = scmp.eq.s32.totalorder %s319_s16, 7 }
   0xa   : > { %s788_s17 = scalar_select %p591_p1, 1, 0 }
   0xb   : > { %p601_p4 = por %p591_p1, %p74_p0  ;;  %p320_p5 = scmp.ge.s32.totalorder %s537_s14, 1 }
   0xc   : > { %p606_p6 = por %p106_p3, %p74_p0  ;;  %p113_p7 = scmp.lt.s32.totalorder %s537_s14, 9 }
   0xd   : > { %s790_s19 = scalar_select %p601_p4, 1, 0 }
   0xe   : > { %s791_s20 = scalar_select %p606_p6, 1, 0 }
   0xf   : > { %p611_p8 = pnand %p320_p5, %p113_p7  ;;  %s28_s22 = sadd.s32 1, %s533_s13 }
  0x10   : > { %p624_p11 = scmp.ge.s32.totalorder %s28_s22, 8  ;;  %s61_s25 = sadd.s32 1, %s525_s11 }
  0x11   : > { %p343_p9 = pneg %p611_p8  ;;  %p68_p12 = scmp.ne.s32.totalorder %s525_s11, %s521_s10 }
  0x12   : > { %p69_p13 = scmp.eq.s32.totalorder %s537_s14, 0  ;;  %s408_s28 = scalar_lea.hbm %s781_s0, 16 }
  0x13   : > { %p620_p10 = pnand %p343_p9, %p591_p1  ;;  %p409_p0 = scmp.ne.s32.totalorder %s781_s0, %s408_s28 }
  0x14   : > { %p415_p9 = scmp.lt.u32.totalorder %s408_s28, %s781_s0 }
  0x15   : > { %p410_p3 = pneg %p620_p10 }
  0x17   : > { %p411_p5 = pnand %p410_p3, %p409_p0 }
  0x19   : > { %p412_p7 = pneg %p411_p5 }
  0x1b   : > { %p417_p6 = pnand %p415_p9, %p412_p7 }
  0x1d   : > { %420 = shalt.err (!%p417_p6)
}
  0x1e   : > { %s539_s5 = smov [#allocation3]   ;;  %s808_s22 = smov (%p624_p11, %s28_s22), 0 }
  0x1f   : > { %346 = dma.hbm_to_smem (!%p620_p10), %s781_s0, 16, %s539_s5, [#allocation6]  }
  0x20   : > { %p655_p6 = por %p69_p13, %p68_p12  ;;  %p664_p0 = por %p595_p2, %p68_p12 }
  0x21   : > { %s57_s16 = ssub.s32 %s533_s13, %s808_s22  ;;  %p356_p3 = scmp.lt.s32.totalorder %s537_s14, 8 }
  0x22   : > { %s796_s15 = scalar_select %p664_p0, 1, 0 }
  0x23   : > { %p59_p5 = scmp.eq.s32.totalorder %s57_s16, 0  ;;  %s135_s23 = sand.u32 1, %s525_s11  }
  0x24   : > { %s323_s24 = sshll.u32 %s135_s23, 1  ;;  %s324_s27 = sshll.u32 %s533_s13, 5 }
  0x25   : > { %s673_s26 = scalar_select %p59_p5, %s525_s11, %s61_s25  }
  0x26   : > { %s679_s30 = scalar_lea.hbm %s782_s1, %s324_s27  ;;  %s139_s18 = scalar_lea.vmem [#allocation7], %s323_s24 }
  0x27   : > { %s148_s3 = sshll.u32 %s139_s18, 4  ;;  %p685_p2 = pnand %p356_p3, %p655_p6  ;;  %s681_s3 = int_to_ptr.vmem [resolvable:$true] %s148_s3 }
  0x28   : > { %s136_s25 = scalar_lea.sflag [#allocation4], %s135_s23  ;;  %s421_s5 = scalar_lea.hbm %s679_s30, 32 }
  0x29   : > { %p422_p10 = scmp.ne.s32.totalorder %s679_s30, %s421_s5  ;;  %p423_p11 = pneg %p685_p2 }
  0x2a   : > { %s426_s16 = scalar_lea.hbm %s782_s1, 256  ;;  %p427_p7 = scmp.lt.u32.totalorder %s679_s30, %s782_s1 }
  0x2b   : > { %p424_p12 = pnand %p423_p11, %p422_p10  ;;  %p428_p9 = scmp.lt.u32.totalorder %s426_s16, %s421_s5 }
  0x2c   : > { %p430_p3 = scmp.lt.u32.totalorder %s421_s5, %s679_s30 }
  0x2d   : > { %p425_p13 = pneg %p424_p12  ;;  %p429_p6 = por %p428_p9, %p427_p7 }
  0x2f   : > { %p431_p5 = por %p430_p3, %p429_p6 }
  0x31   : > { %p432_p0 = pnand %p431_p5, %p425_p13 }
  0x33   : > { %435 = shalt.err (!%p432_p0)
}
  0x34   : > { %s436_s23 = scalar_lea.vmem %s681_s3, 32  ;;  %s540_s27 = smov [#allocation7]  }
  0x35   : > { %p437_p10 = scmp.ne.s32.totalorder %s681_s3, %s436_s23  ;;  %s441_s28 = sshll.u32 %s540_s27, 4  ;;  %s442_s28 = int_to_ptr.vmem [resolvable:$false] %s441_s28 }
  0x36   : > { %s443_s29 = scalar_lea.vmem %s442_s28, 64  ;;  %p444_p1 = scmp.lt.s32.totalorder %s681_s3, %s442_s28 }
  0x37   : > { %p439_p12 = pnand %p437_p10, %p423_p11  ;;  %p445_p7 = scmp.lt.s32.totalorder %s443_s29, %s436_s23 }
  0x39   : > { %p440_p4 = pneg %p439_p12  ;;  %p446_p9 = por %p445_p7, %p444_p1 }
  0x3b   : > { %p447_p6 = pnand %p446_p9, %p440_p4 }
  0x3d   : > { %450 = shalt.err (!%p447_p6)
}
  0x3e   : > { %350 = dma.hbm_to_vmem [thread:$0]  (!%p685_p2), %s679_s30, 32, %s681_s3, %s136_s25  }
  0x3f   : > { %157 = sbr.rel (%p611_p8) target bundleno = 107 (0x6b), region = 28  ;;  %p798_p0 = scmp.ne.s32.totalorder (!%p611_p8), %s788_s17, 0 }
  0x46   : > { %504 = dma.done.wait (%p798_p0), [#allocation6], 16  }
  0x47   : > { %506 = vsyncadd (%p798_p0), [#allocation6], 4294967280  ;;  %s721_s18 = sand.u32 1, %s521_s10   ;;  %p799_p1 = scmp.ne.s32.totalorder %s790_s19, 0 }
  0x48   : > { %s327_s5 = sshll.u32 %s721_s18, 1  ;;  %s164_s4 = scalar_lea.sflag [#allocation4], %s721_s18 }
  0x49   : > { %s167_s6 = scalar_lea.vmem [#allocation7], %s327_s5 }
  0x4a   : > { %508 = dma.done.wait (%p799_p1), %s164_s4, 32  }
  0x4b   : > { %510 = vsyncadd (%p799_p1), %s164_s4, 4294967264 }
  0x4c   : > { %172 = sfence }
  0x4d   : > { %v189_v0 = vld [vmem:[%s167_s6] sm:$0x3]  ;;  %s194_s21 = sld [smem:[#allocation3]]  ;;  %s329_s17 = sld [smem:[#allocation3 + $0x1]] }
  0x4e   : > { %190 = vst [vmem:[#allocation2 + $0x1] sm:$0x3] %v189_v0  ;;  %191 = vst [vmem:[#allocation2 - $0x1] sm:$0x2] %v189_v0  ;;  %s330_s30 = sld [smem:[#allocation3 + $0x2]]  ;;  %s188_s19 = scalar_lea.vmem [#allocation8], %s327_s5 }
  0x4f   : > { %192 = vst [vmem:[#allocation2 + $0x3] sm:$0x1] %v189_v0  ;;  %s224_s3 = sshll.u32 %s188_s19, 4  ;;  %s332_s25 = sshll.u32 %s529_s12, 5  ;;  %s730_s3 = int_to_ptr.vmem [resolvable:$true] %s224_s3 }
  0x50   : > { %s735_s8 = scalar_lea.hbm %s783_s2, %s332_s25  ;;  %s209_s24 = scalar_lea.sflag [#allocation5], %s721_s18 }
  0x51   : > { %s451_s23 = scalar_lea.vmem %s730_s3, 32  ;;  %p800_p8 = scmp.ne.s32.totalorder %s796_s15, 0 }
  0x52   : > { %p452_p4 = scmp.ne.s32.totalorder %s730_s3, %s451_s23  ;;  %s541_s12 = smov [#allocation8]  }
  0x53   : > { %v195_v1 = vstv %s194_s21  ;;  %v199_v2 = vstv %s329_s17  ;;  %s455_s27 = sshll.u32 %s541_s12, 4  ;;  %s456_s27 = int_to_ptr.vmem [resolvable:$false] %s455_s27 }
  0x54   : > { %v204_v6 = vstv %s330_s30  ;;  %p453_p2 = pnand %p452_p4, %p800_p8  ;;  %s457_s28 = scalar_lea.vmem %s456_s27, 64 }
  0x55   : > { %v193_v3 = vld [vmem:[#allocation2] sm:$0x3]  ;;  %p458_p13 = scmp.lt.s32.totalorder %s730_s3, %s456_s27  ;;  %p459_p3 = scmp.lt.s32.totalorder %s457_s28, %s451_s23 }
  0x56   : > { %v197_v4 = vld [vmem:[#allocation2 + $0x1] sm:$0x3]  ;;  %v196_v7 = vmul.f32 %v195_v1, %v193_v3  ;;  %p454_p11 = pneg %p453_p2 }
  0x57   : > { %v202_v5 = vld [vmem:[#allocation2 + $0x2] sm:$0x3]  ;;  %v200_v8 = vmul.f32 %v199_v2, %v197_v4  ;;  %p460_p5 = por %p459_p3, %p458_p13 }
  0x58   : > { %v205_v10 = vmul.f32 %v204_v6, %v202_v5 }
  0x59   : > { %v201_v9 = vadd.f32 %v200_v8, %v196_v7  ;;  %p461_p10 = pnand %p460_p5, %p454_p11 }
  0x5b   : > { %v206_v11 = vadd.f32 %v205_v10, %v201_v9 }
  0x5d   : > { %207 = vst [vmem:[%s188_s19] sm:$0x3] %v206_v11 }
  0x5e   : > { %464 = shalt.err (!%p461_p10)
}
  0x5f   : > { %s465_s29 = scalar_lea.hbm %s735_s8, 32  ;;  %s469_s4 = scalar_lea.hbm %s783_s2, 256 }
  0x60   : > { %p466_p12 = scmp.ne.s32.totalorder %s735_s8, %s465_s29  ;;  %p470_p6 = scmp.lt.u32.totalorder %s735_s8, %s783_s2 }
  0x61   : > { %p471_p0 = scmp.lt.u32.totalorder %s469_s4, %s465_s29  ;;  %p473_p4 = scmp.lt.u32.totalorder %s465_s29, %s735_s8 }
  0x62   : > { %p467_p7 = pnand %p466_p12, %p800_p8 }
  0x63   : > { %p472_p1 = por %p471_p0, %p470_p6 }
  0x64   : > { %p468_p9 = pneg %p467_p7 }
  0x65   : > { %p474_p2 = por %p473_p4, %p472_p1 }
  0x67   : > { %p475_p11 = pnand %p474_p2, %p468_p9 }
  0x69   : > { %478 = shalt.err (!%p475_p11)
}
  0x6a   : > { %341 = dma.vmem_to_hbm [thread:$0]  (%p800_p8), %s730_s3, 32, %s735_s8, %s209_s24  }
  0x6b PF: > { %p358_p13 = scmp.ge.s32.totalorder %s537_s14, 2  ;;  %s236_s17 = sand.u32 1, %s517_s9  }
  0x6c   : > { %p801_p3 = scmp.ne.s32.totalorder %s791_s20, 0  ;;  %s237_s30 = scalar_lea.sflag [#allocation5], %s236_s17 }
  0x6e   : > { %p352_p5 = pnand %p358_p13, %p801_p3 }
  0x70   : > { %512 = dma.done.wait (!%p352_p5), %s237_s30, 32  }
  0x71   : > { %514 = vsyncadd (!%p352_p5), %s237_s30, 4294967264  ;;  %s19_s14 = sadd.s32 1, %s537_s14   ;;  %s802_s9 = smov %s521_s10 }
  0x72   : > { %p16_p10 = scmp.ge.s32.totalorder %s19_s14, 10   ;;  %s803_s10 = smov %s525_s11 }
  0x73   : > { %s804_s11 = smov %s673_s26  ;;  %s805_s12 = smov %s533_s13 }
  0x74   : > { %s806_s13 = smov %s808_s22  ;;  %18 = sbr.rel (!%p16_p10) target bundleno = 7 (0x7), region = 78 }
  0x7b   :  { %242 = vsyncpa [#allocation4], 1 }
  0x7c   :  { %244 = vsyncpa [#allocation4 + $0x1], 1 }
  0x7d   :  { %245 = vsyncpa [#allocation5], 1 }
  0x7e   :  { %247 = vsyncpa [#allocation5 + $0x1], 1 }
  0x7f   :  { %248 = vsyncpa [#allocation6], 1 }
  0x80   :  { %250 = vsyncpa [#allocation6 + $0x1], 1 }

</bundles_post_ra>
